<compile_context>
chip_gen: v5e
topology: v5e:2x2
jax: 0.10.0
libtpu: 0.0.40
codegen_flags: <defaults>
</compile_context>

<pallas_src>
import math
import functools

import jax
import jax.numpy as jnp
from jax import lax
from jax.experimental import pallas as pl
from jax.experimental.pallas import tpu as pltpu


def _round_up(x, m):
    return ((x + m - 1) // m) * m


def _token_sparse_kernel(tokens_ref, side_ref, out_ref, mask_ref, *, num_keep):
    """Per-block body (Bt batch elements per grid step).

    tokens_ref : [Bt, L, C]       tokens (native dtype, no upcast)
    side_ref   : [Bt, 2, L] f32   row 0 = rank in descending sort (0 = best), row 1 = score
    out_ref    : [Bt, Kp, C]      rows 0..K-1 kept tokens, row K extra token, rest padding
    mask_ref   : [Bt, 1, L]       1.0 at kept positions, 0.0 elsewhere
    """
    tokens = tokens_ref[...]                                  # [Bt, L, C] native dtype
    side = side_ref[...]                                      # [Bt, 2, L] f32
    rank = side[:, 0:1, :].astype(jnp.int32)                  # [Bt, 1, L]
    score = side[:, 1:2, :]                                   # [Bt, 1, L] f32
    Bt, L, C = tokens.shape
    Kp = out_ref.shape[1]
    K = num_keep

    # ---- keep mask: single lane-dense compare (exact: rank is a permutation) ------
    keep = rank < K                                           # [Bt, 1, L] bool
    mask_ref[...] = keep.astype(mask_ref.dtype)

    # ---- masked softmax over the dropped scores (kept lanes pinned to -BIG) -------
    masked = jnp.where(keep, jnp.float32(-3.0e38), score)     # [Bt, 1, L]
    m = jnp.max(masked, axis=-1, keepdims=True)               # [Bt, 1, 1]
    e = jnp.exp(masked - m)                                    # kept lanes underflow to 0
    z = jnp.sum(e, axis=-1, keepdims=True)                    # [Bt, 1, 1]
    w = e * pl.reciprocal(z)                                   # [Bt, 1, L] f32 (exact div)

    # ---- fused gather + extra-token matmul -----------------------------------------
    # W[b, k, l] = 1 iff token l has rank k (k < K), W[b, K, l] = softmax weight.
    # One [Kp, L] x [L, C] matmul per batch element; rows > K are padding (sliced off
    # by the wrapper).
    row_iota = lax.broadcasted_iota(jnp.int32, (1, Kp, L), 1)  # built once, broadcast
    onehot = (rank == row_iota).astype(jnp.float32)            # [Bt, Kp, L]
    W = jnp.where(row_iota == K, w, onehot)                    # row K = softmax weights
    out = jnp.einsum('bkl,blc->bkc', W.astype(tokens.dtype), tokens,
                     preferred_element_type=jnp.float32)       # [Bt, Kp, C]
    out_ref[...] = out.astype(out_ref.dtype)


def _vmem_capacity_bytes(default=64 * 1024 * 1024):
    try:
        info = pltpu.get_tpu_info()
        cap = getattr(info, "vmem_capacity_bytes", None)
        if cap:
            return int(cap)
    except Exception:
        pass
    return default


def _block_bytes_per_batch(L, C, Kp, token_itemsize):
    """Conservative VMEM bytes used per batch element in one grid step."""
    return (2 * L * C * token_itemsize        # tokens in   (double buffered)
            + 2 * 2 * L * 4                   # side rows   (double buffered)
            + 2 * Kp * C * token_itemsize     # fused out   (double buffered)
            + 2 * L * 4                       # mask out    (double buffered)
            + Kp * L * 4                      # W intermediate (f32)
            + Kp * C * 4                      # f32 accumulator
            + L * C * 4)                      # headroom for copies / spills


def _pick_batch_block(B, per_b_bytes, vmem_budget_bytes, max_bt=8):
    bt = max(1, min(B, max_bt, vmem_budget_bytes // max(per_b_bytes, 1)))
    # Keep >= 2 grid steps so the 'parallel' batch axis can shard across both
    # TensorCores on v7x (harmless extra step on single-TC v5e/v6e).
    while bt > 1 and (B % bt != 0 or B // bt < 2):
        bt -= 1
    if B % bt != 0:
        bt = 1
    return bt


def token_sparse(tokens, attention_x, attention_y, sparse_ratio=0.6,
                 batch_block=None):
    """Pallas implementation of TokenSparse.forward.

    Returns (select_tokens [B,K,C], extra_token [B,1,C], score_mask [B,L]).
    """
    B, L, C = tokens.shape
    K = math.ceil(L * sparse_ratio)
    score = (attention_x + attention_y).astype(jnp.float32)   # [B, L]

    if K >= L:
        # Degenerate case (sparse_ratio -> 1): nothing is dropped, softmax over an
        # empty set => extra token is zero.  Handled in plain JAX.
        order = jnp.argsort(-score, axis=1)
        sel = jnp.take_along_axis(tokens, order[..., None], axis=1)
        return sel, jnp.zeros((B, 1, C), tokens.dtype), jnp.ones_like(score)

    # TODO(synk): descending sort/argsort has no Pallas TPU primitive; done in JAX glue.
    order = jnp.argsort(-score, axis=1)                        # [B, L]
    # rank (inverse permutation) via a scatter of iota -- avoids a second argsort.
    iota = jnp.broadcast_to(jnp.arange(L, dtype=jnp.float32), (B, L))
    rank = jnp.zeros((B, L), jnp.float32).at[
        jnp.arange(B)[:, None], order].set(iota)               # [B, L] f32 (exact ints)

    side = jnp.stack([rank, score], axis=1)                    # [B, 2, L] one side DMA

    Kp = _round_up(K + 1, 8)                                   # sublane-dense output rows
    item = jnp.dtype(tokens.dtype).itemsize
    per_b = _block_bytes_per_batch(L, C, Kp, item)
    vmem_cap = _vmem_capacity_bytes()
    budget = int(0.4 * vmem_cap)

    Bt = batch_block if batch_block is not None else _pick_batch_block(B, per_b, budget)
    assert B % Bt == 0, "batch_block must divide batch size"

    vmem_limit = int(min(0.9 * vmem_cap, max(32 * 1024 * 1024, 2 * per_b * Bt)))

    kernel = functools.partial(_token_sparse_kernel, num_keep=K)

    out_shapes = (
        jax.ShapeDtypeStruct((B, Kp, C), tokens.dtype),        # kept rows + extra row
        jax.ShapeDtypeStruct((B, 1, L), score.dtype),          # mask
    )

    grid_spec = pltpu.PrefetchScalarGridSpec(
        num_scalar_prefetch=0,
        grid=(B // Bt,),
        in_specs=[
            pl.BlockSpec((Bt, L, C), lambda g: (g, 0, 0)),     # tokens (native dtype)
            pl.BlockSpec((Bt, 2, L), lambda g: (g, 0, 0)),     # rank+score (lane-dense)
        ],
        out_specs=[
            pl.BlockSpec((Bt, Kp, C), lambda g: (g, 0, 0)),    # fused select+extra
            pl.BlockSpec((Bt, 1, L), lambda g: (g, 0, 0)),     # score_mask
        ],
    )

    fused, score_mask = pl.pallas_call(
        kernel,
        out_shape=out_shapes,
        grid_spec=grid_spec,
        compiler_params=pltpu.CompilerParams(
            dimension_semantics=("parallel",),                 # batch axis -> megacore
            vmem_limit_bytes=vmem_limit,                       # derived from block sizes
        ),
    )(tokens, side)

    select_tokens = fused[:, :K, :]                            # padding rows dropped
    extra_token = fused[:, K:K + 1, :]                         # fused row K
    return select_tokens, extra_token, score_mask[:, 0, :]


def token_sparse_reference(tokens, attention_x, attention_y, sparse_ratio=0.6):
    """Plain-JAX reference mirroring the PyTorch forward."""
    B, L, C = tokens.shape
    K = math.ceil(L * sparse_ratio)
    score = attention_x + attention_y
    order = jnp.argsort(-score, axis=1)
    score_sort = jnp.take_along_axis(score, order, axis=1)
    keep = order[:, :K]
    mask = jnp.zeros_like(score).at[jnp.arange(B)[:, None], keep].set(1.0)
    sel = jnp.take_along_axis(tokens, keep[..., None], axis=1)
    non = jnp.take_along_axis(tokens, order[:, K:][..., None], axis=1)
    w = jax.nn.softmax(score_sort[:, K:], axis=1)[..., None]
    extra = jnp.sum(non * w, axis=1, keepdims=True)
    return sel, extra, mask


if __name__ == "__main__":
    # Small shapes consistent with the module: B=2, L=8 tokens, C=32 channels.
    # TokenSparse has no learnable parameters (embed_dim is unused in forward).
    B, L, C = 2, 8, 32
    sparse_ratio = 0.6

    key = jax.random.PRNGKey(0)
    k_tok, k_ax, k_ay = jax.random.split(key, 3)
    tokens = jax.random.normal(k_tok, (B, L, C), dtype=jnp.float32)
    attention_x = jax.random.normal(k_ax, (B, L), dtype=jnp.float32)
    attention_y = jax.random.normal(k_ay, (B, L), dtype=jnp.float32)

    sel, extra, mask = token_sparse(tokens, attention_x, attention_y, sparse_ratio)
    jax.block_until_ready((sel, extra, mask))

    sel_ref, extra_ref, mask_ref = token_sparse_reference(
        tokens, attention_x, attention_y, sparse_ratio)

    assert sel.shape == sel_ref.shape and extra.shape == extra_ref.shape
    assert mask.shape == mask_ref.shape
    # select / mask are exact (0/1 one-hot gather rows, integer compare).
    assert jnp.allclose(sel, sel_ref, atol=1e-5, rtol=1e-5)
    assert jnp.allclose(mask, mask_ref, atol=1e-6)
    # extra differs only by summation order (exact reciprocal, f32 MXU accumulation).
    assert jnp.allclose(extra, extra_ref, atol=1e-4, rtol=1e-4)

    print("KERNEL_OK")
</pallas_src>

<mosaic_0001>
module attributes {stable_mosaic.version = 11 : i64} {
  func.func @_token_sparse_kernel(%arg0: i32, %arg1: memref<1x8x32xf32, #tpu.memory_space<vmem>>, %arg2: memref<1x2x8xf32, #tpu.memory_space<vmem>>, %arg3: memref<1x8x32xf32, #tpu.memory_space<vmem>>, %arg4: memref<1x1x8xf32, #tpu.memory_space<vmem>>) attributes {dimension_semantics = [#tpu.dimension_semantics<parallel>], iteration_bounds = array<i64: 2>, scalar_prefetch = 0 : i64, scratch_operands = 0 : i64, tpu.core_type = #tpu.core_type<tc>, window_params = [{transform_indices = @transform_0, window_bounds = array<i64: 1, 8, 32>}, {transform_indices = @transform_1, window_bounds = array<i64: 1, 2, 8>}, {transform_indices = @transform_2, window_bounds = array<i64: 1, 8, 32>}, {transform_indices = @transform_3, window_bounds = array<i64: 1, 1, 8>}]} {
    %c0 = arith.constant 0 : index
    %c0_0 = arith.constant 0 : index
    %c0_1 = arith.constant 0 : index
    %0 = vector.load %arg1[%c0, %c0_0, %c0_1] : memref<1x8x32xf32, #tpu.memory_space<vmem>>, vector<1x8x32xf32>
    %c0_2 = arith.constant 0 : index
    %c0_3 = arith.constant 0 : index
    %c0_4 = arith.constant 0 : index
    %1 = vector.load %arg2[%c0_2, %c0_3, %c0_4] : memref<1x2x8xf32, #tpu.memory_space<vmem>>, vector<1x2x8xf32>
    %2 = vector.extract_strided_slice %1 {offsets = [0, 0, 0], sizes = [1, 1, 8], strides = [1, 1, 1]} : vector<1x2x8xf32> to vector<1x1x8xf32>
    %3 = arith.fptosi %2 : vector<1x1x8xf32> to vector<1x1x8xi32>
    %4 = vector.extract_strided_slice %1 {offsets = [0, 1, 0], sizes = [1, 1, 8], strides = [1, 1, 1]} : vector<1x2x8xf32> to vector<1x1x8xf32>
    %c5_i32 = arith.constant 5 : i32
    %5 = vector.broadcast %c5_i32 : i32 to vector<1x1x8xi32>
    %6 = arith.cmpi slt, %3, %5 : vector<1x1x8xi32>
    %7 = arith.extui %6 : vector<1x1x8xi1> to vector<1x1x8xi32>
    %8 = arith.sitofp %7 : vector<1x1x8xi32> to vector<1x1x8xf32>
    %c0_5 = arith.constant 0 : index
    %c0_6 = arith.constant 0 : index
    %c0_7 = arith.constant 0 : index
    %9 = vector.load %arg4[%c0_5, %c0_6, %c0_7] : memref<1x1x8xf32, #tpu.memory_space<vmem>>, vector<1x1x8xf32>
    tpu.vector_store %arg4[%c0_5, %c0_6, %c0_7], %8 {strides = array<i32>} : memref<1x1x8xf32, #tpu.memory_space<vmem>>, vector<1x1x8xf32>,
    %cst = arith.constant -3.000000e+38 : f32
    %10 = vector.broadcast %cst : f32 to vector<1x1x8xf32>
    %11 = arith.select %6, %10, %4 : vector<1x1x8xi1>, vector<1x1x8xf32>
    %cst_8 = arith.constant dense<0xFF800000> : vector<1x1xf32>
    %12 = vector.multi_reduction <maximumf>, %11, %cst_8 [2] : vector<1x1x8xf32> to vector<1x1xf32>
    %13 = vector.shape_cast %12 : vector<1x1xf32> to vector<1x1x1xf32>
    %14 = vector.broadcast %13 : vector<1x1x1xf32> to vector<1x1x8xf32>
    %15 = arith.subf %11, %14 : vector<1x1x8xf32>
    %16 = math.exp %15 : vector<1x1x8xf32>
    %cst_9 = arith.constant dense<0.000000e+00> : vector<1x1xf32>
    %17 = vector.multi_reduction <add>, %16, %cst_9 [2] : vector<1x1x8xf32> to vector<1x1xf32>
    %18 = vector.shape_cast %17 : vector<1x1xf32> to vector<1x1x1xf32>
    %19 = tpu.reciprocal %18 : vector<1x1x1xf32> -> vector<1x1x1xf32>
    %20 = vector.broadcast %19 : vector<1x1x1xf32> to vector<1x1x8xf32>
    %21 = arith.mulf %16, %20 : vector<1x1x8xf32>
    %22 = tpu.iota {dimensions = array<i32: 1>} : vector<1x8x8xi32>
    %23 = vector.broadcast %3 : vector<1x1x8xi32> to vector<1x8x8xi32>
    %24 = arith.cmpi eq, %23, %22 : vector<1x8x8xi32>
    %25 = arith.extui %24 : vector<1x8x8xi1> to vector<1x8x8xi32>
    %26 = arith.sitofp %25 : vector<1x8x8xi32> to vector<1x8x8xf32>
    %c5_i32_10 = arith.constant 5 : i32
    %27 = vector.broadcast %c5_i32_10 : i32 to vector<1x8x8xi32>
    %28 = arith.cmpi eq, %22, %27 : vector<1x8x8xi32>
    %29 = vector.shape_cast %21 : vector<1x1x8xf32> to vector<1x1x8xf32>
    %30 = vector.broadcast %29 : vector<1x1x8xf32> to vector<1x8x8xf32>
    %31 = arith.select %28, %30, %26 : vector<1x8x8xi1>, vector<1x8x8xf32>
    "tpu.trace_start"() <{level = 10 : i32, message = "bkl,blc->bkc"}> : () -> ()
    %cst_11 = arith.constant dense<0.000000e+00> : vector<1x8x32xf32>
    %32 = tpu.matmul %31, %0, %cst_11 {dimension_numbers = #tpu.dot_dimension_numbers<[2], [1], [1], [2], [0, 0, 0, 1, 1, 2], [0], [0]>} : vector<1x8x8xf32>, vector<1x8x32xf32>, vector<1x8x32xf32> -> vector<1x8x32xf32>
    "tpu.trace_stop"() : () -> ()
    %c0_12 = arith.constant 0 : index
    %c0_13 = arith.constant 0 : index
    %c0_14 = arith.constant 0 : index
    %33 = vector.load %arg3[%c0_12, %c0_13, %c0_14] : memref<1x8x32xf32, #tpu.memory_space<vmem>>, vector<1x8x32xf32>
    tpu.vector_store %arg3[%c0_12, %c0_13, %c0_14], %32 {strides = array<i32>} : memref<1x8x32xf32, #tpu.memory_space<vmem>>, vector<1x8x32xf32>,
    return
  }
  func.func @transform_0(%arg0: i32) -> (i32, i32, i32) {
    %c0_i32 = arith.constant 0 : i32
    %c0_i32_0 = arith.constant 0 : i32
    %c0_i32_1 = arith.constant 0 : i32
    return %arg0, %c0_i32, %c0_i32_0 : i32, i32, i32
  }
  func.func @transform_1(%arg0: i32) -> (i32, i32, i32) {
    %c0_i32 = arith.constant 0 : i32
    %c0_i32_0 = arith.constant 0 : i32
    %c0_i32_1 = arith.constant 0 : i32
    return %arg0, %c0_i32, %c0_i32_0 : i32, i32, i32
  }
  func.func @transform_2(%arg0: i32) -> (i32, i32, i32) {
    %c0_i32 = arith.constant 0 : i32
    %c0_i32_0 = arith.constant 0 : i32
    %c0_i32_1 = arith.constant 0 : i32
    return %arg0, %c0_i32, %c0_i32_0 : i32, i32, i32
  }
  func.func @transform_3(%arg0: i32) -> (i32, i32, i32) {
    %c0_i32 = arith.constant 0 : i32
    %c0_i32_0 = arith.constant 0 : i32
    %c0_i32_1 = arith.constant 0 : i32
    return %arg0, %c0_i32, %c0_i32_0 : i32, i32, i32
  }
}

</mosaic_0001>

<bundles_post_ra>
// kernel: tpu_custom_call.1
= control target key start
LH: loop header
LB: loop body
LE: loop exit
PB: predicated region body
PF: predicated region fallthrough
CT: control target
= control target key end

     0   :  { %9 = vsyncpa [#allocation3], 0  ;;  %s925_s0 = inlined_call_operand.hbm [shape: f32[2,8,32], index: 0, kind: input, shape index: {}]   ;;  %s926_s1 = inlined_call_operand.hbm [shape: f32[2,2,8], index: 1, kind: input, shape index: {}]   ;;  %s927_s2 = inlined_call_operand.hbm [shape: f32[2,8,32], index: 2, kind: output, shape index: {0}]   ;;  %s928_s3 = inlined_call_operand.hbm [shape: f32[2,1,8], index: 3, kind: output, shape index: {1}]  }
   0x1   :  { %11 = vsyncpa [#allocation3 + $0x1], 0 }
   0x2   :  { %12 = vsyncpa [#allocation6], 0 }
   0x3   :  { %14 = vsyncpa [#allocation6 + $0x1], 0 }
   0x4   :  { %15 = vsyncpa [#allocation4], 0 }
   0x5   :  { %17 = vsyncpa [#allocation4 + $0x1], 0 }
   0x6   :  { %18 = vsyncpa [#allocation9], 0 }
   0x7   :  { %20 = vsyncpa [#allocation9 + $0x1], 0  ;;  %s731_s12 = smov 0   ;;  %s733_s13 = smov 0  }
   0x8   :  { %s735_s14 = smov 0   ;;  %s737_s15 = smov 0  }
   0x9 LB: > { %s752_s16 = sadd.s32 4294967295, %s708_s15   ;;  %s462_s17 = sadd.s32 4294967294, %s708_s15   ;;  %s708_s15 = sphi %s737_s15, %s941_s15   ;;  %s704_s14 = sphi %s735_s14, %s940_s14   ;;  %s700_s13 = sphi %s733_s13, %s939_s13   ;;  %s696_s12 = sphi %s731_s12, %s938_s12  }
   0xa   : > { %s756_s18 = sadd.s32 1, %s708_s15   ;;  %s33_s19 = sadd.s32 1, %s704_s14 }
   0xb   : > { %s30_s20 = ssub.s32 %s708_s15, %s756_s18  ;;  %p40_p0 = scmp.ne.s32.totalorder %s704_s14, %s700_s13 }
   0xc   : > { %p31_p1 = scmp.eq.s32.totalorder %s30_s20, 0  ;;  %p41_p2 = scmp.eq.s32.totalorder %s708_s15, 0 }
   0xd   : > { %p46_p3 = scmp.ne.s32.totalorder %s700_s13, %s696_s12  ;;  %p47_p4 = scmp.eq.s32.totalorder %s752_s16, 0 }
   0xe   : > { %s768_s21 = scalar_select %p31_p1, %s704_s14, %s33_s19  }
   0xf   : > { %p770_p5 = por %p41_p2, %p40_p0  ;;  %p774_p6 = por %p47_p4, %p46_p3 }
  0x10   : > { %p96_p7 = scmp.eq.s32.totalorder %s752_s16, 1  ;;  %p102_p8 = scmp.eq.s32.totalorder %s462_s17, 1 }
  0x11   : > { %p507_p10 = scmp.lt.s32.totalorder %s708_s15, 2  ;;  %s790_s26 = sand.u32 1, %s704_s14  }
  0x12   : > { %p781_p11 = por %p96_p7, %p40_p0  ;;  %p785_p12 = por %p102_p8, %p46_p3 }
  0x13   : > { %s466_s27 = sshll.u32 %s708_s15, 3  ;;  %s465_s28 = sshll.u32 %s790_s26, 3 }
  0x14   : > { %s156_s4 = scalar_lea.hbm %s925_s0, %s466_s27  ;;  %s152_s6 = scalar_lea.vmem [#allocation2], %s465_s28 }
  0x15   : > { %s158_s5 = sshll.u32 %s156_s4, 4  ;;  %s160_s7 = sshll.u32 %s152_s6, 4  ;;  %s159_s5 = int_to_ptr.hbm [resolvable:$true] %s158_s5  ;;  %s161_s7 = int_to_ptr.vmem [resolvable:$true] %s160_s7 }
  0x16   : > { %p799_p13 = pnand %p507_p10, %p770_p5  ;;  %p469_p0 = scmp.ge.s32.totalorder %s708_s15, 1 }
  0x17   : > { %p184_p1 = scmp.lt.s32.totalorder %s708_s15, 3  ;;  %s467_s9 = sshll.u32 %s790_s26, 1 }
  0x18   : > { %s149_s10 = scalar_lea.sflag [#allocation3], %s790_s26  ;;  %s546_s11 = sshra.s32 %s159_s5, 4  ;;  %s547_s11 = int_to_ptr.hbm [resolvable:$true] %s546_s11 }
  0x19   : > { %s548_s17 = scalar_lea.hbm %s547_s11, 8  ;;  %p550_p3 = pneg %p799_p13 }
  0x1a   : > { %p549_p2 = scmp.ne.s32.totalorder %s547_s11, %s548_s17  ;;  %s553_s22 = scalar_lea.hbm %s925_s0, 16 }
  0x1b   : > { %p554_p5 = scmp.lt.s32.totalorder %s547_s11, %s925_s0  ;;  %p555_p8 = scmp.lt.s32.totalorder %s553_s22, %s548_s17 }
  0x1c   : > { %p551_p4 = pnand %p550_p3, %p549_p2 }
  0x1d   : > { %p556_p10 = por %p555_p8, %p554_p5 }
  0x1e   : > { %p552_p7 = pneg %p551_p4 }
  0x20   : > { %p557_p9 = pnand %p556_p10, %p552_p7 }
  0x22   : > { %560 = shalt.err (!%p557_p9)
}
  0x23   : > { %496 = dma.hbm_to_vmem [thread:$0]  (!%p799_p13), %s159_s5, 128, %s161_s7, %s149_s10  }
  0x24   : > { %p824_p2 = pnand %p469_p0, %p184_p1  ;;  %s468_s30 = sshll.u32 %s708_s15, 1 }
  0x25   : > { %s171_s4 = scalar_lea.vmem [#allocation5], %s467_s9  ;;  %s175_s19 = scalar_lea.hbm %s926_s1, %s468_s30 }
  0x26   : > { %s179_s6 = sshll.u32 %s171_s4, 4  ;;  %s177_s20 = sshll.u32 %s175_s19, 4  ;;  %s180_s6 = int_to_ptr.vmem [resolvable:$true] %s179_s6  ;;  %s178_s20 = int_to_ptr.hbm [resolvable:$true] %s177_s20 }
  0x27   : > { %s168_s22 = scalar_lea.sflag [#allocation6], %s790_s26  ;;  %s576_s27 = sshra.s32 %s178_s20, 4  ;;  %s577_s27 = int_to_ptr.hbm [resolvable:$true] %s576_s27 }
  0x28   : > { %s578_s5 = scalar_lea.hbm %s577_s27, 2  ;;  %s583_s9 = scalar_lea.hbm %s926_s1, 4 }
  0x29   : > { %p579_p9 = scmp.ne.s32.totalorder %s577_s27, %s578_s5  ;;  %p584_p4 = scmp.lt.s32.totalorder %s577_s27, %s926_s1 }
  0x2a   : > { %p585_p7 = scmp.lt.s32.totalorder %s583_s9, %s578_s5 }
  0x2b   : > { %p581_p0 = pnand %p579_p9, %p550_p3 }
  0x2c   : > { %p586_p5 = por %p585_p7, %p584_p4 }
  0x2d   : > { %p582_p1 = pneg %p581_p0 }
  0x2f   : > { %p587_p8 = pnand %p586_p5, %p582_p1 }
  0x31   : > { %590 = shalt.err (!%p587_p8)
}
  0x32   : > { %499 = dma.hbm_to_vmem [thread:$0]  (!%p799_p13), %s178_s20, 32, %s180_s6, %s168_s22  }
  0x33   : > { %188 = sbr.rel (%p824_p2) target bundleno = 464 (0x1d0), region = 28  ;;  %s847_s26 = sand.u32 (!%p824_p2), 1, %s700_s13  }
  0x34   : > { %s470_s30 = sshll.u32 (!%p824_p2), %s847_s26, 3  ;;  %s191_s11 = scalar_lea.sflag (!%p824_p2), [#allocation3], %s847_s26 }
  0x35   : > { %s194_s17 = scalar_lea.vmem (!%p824_p2), [#allocation2], %s470_s30 }
  0x38   : > { %679 = dma.done.wait (%p774_p6), %s191_s11, 128  }
  0x39   : > { %681 = vsyncadd (%p774_p6), %s191_s11, 4294967168  ;;  %s471_s8 = sshll.u32 %s847_s26, 1  ;;  %s201_s29 = scalar_lea.sflag [#allocation6], %s847_s26 }
  0x3a   : > { %s204_s6 = scalar_lea.vmem [#allocation5], %s471_s8 }
  0x3b   : > { %683 = dma.done.wait (%p774_p6), %s201_s29, 32  }
  0x3c   : > { %685 = vsyncadd (%p774_p6), %s201_s29, 4294967264  ;;  %v238_v0 = vld [vmem:[%s204_s6] sm:$0x3]  ;;  %vm243_vm1 = vcmask 57344   ;;  %v237_v14 = vld [vmem:[%s194_s17] sm:$0xff]  ;;  %v273_v18 = vlaneseq  ;;  %v710_v28 = vmov 0.0   ;;  %s336_s22 = scalar_lea.hbm %s928_s3, %s752_s16 }
  0x3d   : > { %vm480_vm0 = vcmp.lt.s32.totalorder %v238_v0, 0  ;;  %v481_v1 = vceil.f32 %v238_v0  ;;  %v482_v2 = vfloor.f32 %v238_v0  ;;  %v246_v4 = vrot.slane %v238_v0, 1  ;;  %301 = vmatpush.msra.mxu0 %v237_v14  ;;  %s236_s23 = scalar_lea.vmem [#allocation8], %s847_s26  ;;  %s340_s5 = sshll.u32 %s336_s22, 4  ;;  %s341_s5 = int_to_ptr.hbm [resolvable:$true] %s340_s5 }
  0x3e   : > { %v274_v24 = vshrl.u32 %v273_v18, 7  ;;  %vm282_vm9 = vcmask 64512   ;;  %s338_s27 = sshll.u32 %s236_s23, 4  ;;  %s314_s7 = scalar_lea.sflag [#allocation9], %s847_s26  ;;  %s339_s27 = int_to_ptr.vmem [resolvable:$true] %s338_s27 }
  0x3f   : > { %v483_v3 = vsel %vm480_vm0, %v481_v1, %v482_v2  ;;  %s620_s10 = sshra.s32 %s341_s5, 4  ;;  %s626_s11 = scalar_lea.hbm %s928_s3, 2  ;;  %s621_s10 = int_to_ptr.hbm [resolvable:$true] %s620_s10 }
  0x40   : > { %v484_v5 = vcvt.f32.s32 %v483_v3  ;;  %vm279_vm8 = vcmp.eq.s32.totalorder %v274_v24, 5  ;;  %s622_s9 = scalar_lea.hbm %s621_s10, 1  ;;  %p627_p10 = scmp.lt.s32.totalorder %s621_s10, %s928_s3 }
  0x41   : > { %p623_p6 = scmp.ne.s32.totalorder %s621_s10, %s622_s9  ;;  %p628_p2 = scmp.lt.s32.totalorder %s626_s11, %s622_s9 }
  0x42   : > { %vm863_vm2 = vcmp.lt.s32.totalorder %v484_v5, 5  ;;  %v275_v20 = vperm.slane %v484_v5, 0 }
  0x43   : > { %v248_v7 = vsel %vm863_vm2, -3e+38, %v246_v4  ;;  %v473_v29 = vsel %vm863_vm2, 1.0, %v710_v28  ;;  %p624_p13 = pnand %p623_p6, %p781_p11  ;;  %p629_p9 = por %p628_p2, %p627_p10 }
  0x44   : > { %v249_v8 = vsel %vm243_vm1, %v248_v7, -inf  ;;  %vm276_vm7 = vcmp.eq.s32.totalorder %v275_v20, %v274_v24  ;;  %244 = vst.msk [vmem:[%s236_s23] sm:$0x1] %vm243_vm1, %v473_v29 }
  0x45   : > { %250 = vmax.xlane.f32.xlu0 %v249_v8  ;;  %v474_v32 = vsel %vm276_vm7, 1.0, %v710_v28  ;;  %p625_p3 = pneg %p624_p13 }
  0x47   : > { %p630_p0 = pnand %p629_p9, %p625_p3 }
  0xb8   : > { %v251_v9 = vpop.xlane.xlu0 %250 }
  0xb9   : > { %v252_v10 = vsub.f32 %v248_v7, %v251_v9 }
  0xbb   : > { %v253_v11 = vmul.f32 1.442695, %v252_v10 }
  0xbd   : > { %542 = vpow2.f32 %v253_v11 }
  0xc3   : > { %v543_v12 = vpop.eup %542 }
  0xc4   : > { %v255_v13 = vsel %vm243_vm1, %v543_v12, 0.0 }
  0xc5   : > { %256 = vadd.xlane.f32.xlu0 %v255_v13 }
 0x138   : > { %v257_v15 = vpop.xlane.xlu0 %256 }
 0x139   : > { %544 = vrcp.f32 %v257_v15  ;;  %v269_v21 = vand.u32 2147483648, %v257_v15  ;;  %v267_v23 = vand.u32 2147483647, %v257_v15  ;;  %vm263_vm4 = vweird.f32 %v257_v15 }
 0x13b   : > { %v270_v26 = vor.u32 1.1754944e-38, %v269_v21  ;;  %vm268_vm6 = vcmp.eq.f32.partialorder %v267_v23, 8.507059e+37 }
 0x13f   : > { %v545_v16 = vpop.eup %544 }
 0x140   : > { %v259_v17 = vmul.f32 %v545_v16, %v257_v15  ;;  %vm264_vm3 = vweird.f32 %v545_v16 }
 0x141   : > { %vm265_vm5 = vmor %vm263_vm4, %vm264_vm3 }
 0x142   : > { %v260_v19 = vsub.f32 1.0, %v259_v17 }
 0x144   : > { %v261_v22 = vmul.f32 %v545_v16, %v260_v19 }
 0x146   : > { %v262_v25 = vadd.f32 %v545_v16, %v261_v22 }
 0x148   : > { %v266_v27 = vsel %vm265_vm5, %v545_v16, %v262_v25 }
 0x149   : > { %v271_v30 = vsel %vm268_vm6, %v270_v26, %v266_v27 }
 0x14a   : > { %v272_v31 = vmul.f32 %v543_v12, %v271_v30 }
 0x14c   : > { %v280_v33 = vperm.slane %v272_v31, 0 }
 0x14e   : > { %v281_v34 = vsel %vm279_vm8, %v280_v33, %v474_v32 }
 0x14f   : > { %475 = vmatmul.msk.f32.vlgmr.msra.gmra.mxu0 %vm282_vm9, %v281_v34 }
 0x150   : > { %633 = shalt.err (!%p630_p0)
}
 0x151   : > { %490 = dma.vmem_to_hbm [thread:$0]  (%p781_p11), %s339_s27, 16, %s341_s5, %s314_s7   ;;  %vm306_vm10 = vcmask 261120  }
 0x152   : > { %s477_s29 = sshll.u32 %s752_s16, 3  ;;  %s230_s20 = scalar_lea.vmem [#allocation7], %s470_s30 }
 0x153   : > { %s323_s19 = scalar_lea.hbm %s927_s2, %s477_s29  ;;  %s325_s22 = sshll.u32 %s230_s20, 4  ;;  %s326_s22 = int_to_ptr.vmem [resolvable:$true] %s325_s22 }
 0x154   : > { %s327_s10 = sshll.u32 %s323_s19, 4  ;;  %s309_s9 = scalar_lea.sflag [#allocation4], %s847_s26  ;;  %s328_s10 = int_to_ptr.hbm [resolvable:$true] %s327_s10 }
 0x155   : > { %s648_s28 = sshra.s32 %s328_s10, 4  ;;  %s654_s5 = scalar_lea.hbm %s927_s2, 16  ;;  %s649_s28 = int_to_ptr.hbm [resolvable:$true] %s648_s28 }
 0x156   : > { %s650_s4 = scalar_lea.hbm %s649_s28, 8  ;;  %p655_p5 = scmp.lt.s32.totalorder %s649_s28, %s927_s2 }
 0x157   : > { %p651_p1 = scmp.ne.s32.totalorder %s649_s28, %s650_s4  ;;  %p656_p8 = scmp.lt.s32.totalorder %s654_s5, %s650_s4 }
 0x159   : > { %p652_p4 = pnand %p651_p1, %p781_p11  ;;  %p657_p6 = por %p656_p8, %p655_p5 }
 0x15b   : > { %p653_p7 = pneg %p652_p4 }
 0x15d   : > { %p658_p13 = pnand %p657_p6, %p653_p7 }
 0x1cc   : > { %v303_v35 = vpop.f32.mrf.mxu0 }
 0x1cd   : > { %307 = vst.msk [vmem:[%s230_s20] sm:$0xff] %vm306_vm10, %v303_v35 }
 0x1ce   : > { %661 = shalt.err (!%p658_p13)
}
 0x1cf   : > { %489 = dma.vmem_to_hbm [thread:$0]  (%p781_p11), %s326_s22, 128, %s328_s10, %s309_s9  }
 0x1d0 PF: > { %s352_s26 = sand.u32 1, %s696_s12   ;;  %p937_p3 = scmp.ge.s32.totalorder %s708_s15, 2 }
 0x1d1   : > { %s353_s11 = scalar_lea.sflag [#allocation4], %s352_s26 }
 0x1d2   : > { %p501_p10 = pnand %p937_p3, %p785_p12 }
 0x1d4   : > { %p502_p2 = pneg %p501_p10 }
 0x1d6   : > { %687 = dma.done.wait (%p502_p2), %s353_s11, 128  }
 0x1d7   : > { %689 = vsyncadd (%p502_p2), %s353_s11, 4294967168  ;;  %s363_s17 = scalar_lea.sflag [#allocation9], %s352_s26 }
 0x1d8   : > { %691 = dma.done.wait (%p502_p2), %s363_s17, 16  }
 0x1d9   : > { %693 = vsyncadd (%p502_p2), %s363_s17, 4294967280  ;;  %p23_p11 = scmp.ge.s32.totalorder %s756_s18, 4   ;;  %s938_s12 = smov %s700_s13 }
 0x1da   : > { %s939_s13 = smov %s704_s14  ;;  %s940_s14 = smov %s768_s21 }
 0x1db   : > { %s941_s15 = smov %s756_s18  ;;  %25 = sbr.rel (!%p23_p11) target bundleno = 9 (0x9), region = 103 }
 0x1e0   :  { %368 = vsyncpa [#allocation3], 1 }
 0x1e1   :  { %370 = vsyncpa [#allocation3 + $0x1], 1 }
 0x1e2   :  { %371 = vsyncpa [#allocation6], 1 }
 0x1e3   :  { %373 = vsyncpa [#allocation6 + $0x1], 1 }
 0x1e4   :  { %374 = vsyncpa [#allocation4], 1 }
 0x1e5   :  { %376 = vsyncpa [#allocation4 + $0x1], 1 }
 0x1e6   :  { %377 = vsyncpa [#allocation9], 1 }
 0x1e7   :  { %379 = vsyncpa [#allocation9 + $0x1], 1 }

</bundles_post_ra>
